<compile_context>
chip_gen: v7x
topology: tpu7x:2x2x1
jax: 0.10.0
libtpu: 0.0.40
codegen_flags: <defaults>
</compile_context>

<pallas_src>
import jax
import jax.numpy as jnp
import numpy as np
from jax.experimental import pallas as pl
from jax.experimental.pallas import tpu as pltpu

ALPHA = 0.2        # leaky_relu negative slope
NEG_BIG = 1e30     # additive mask magnitude for the global max pool
EPS = 1e-10


# ---------------------------------------------------------------------------
# Fused kernel: all heads + ELU + global max pool + final Linear.
# ---------------------------------------------------------------------------
def spgat_fused_kernel(x_ref, s_ref, st_ref, t_ref, w_ref, acat_ref, bcast_ref,
                       bias_ref, mask_ref, lw_ref, lb_ref, out_ref):
    # x_ref     [N, nfeat]   f32   node features
    # s_ref     [E, N]       bf16  one-hot source incidence (row e -> src[e])
    # st_ref    [N, E]       bf16  transposed source incidence (scatter-add)
    # t_ref     [E, N]       bf16  one-hot target incidence (row e -> tgt[e])
    # w_ref     [nfeat, H]   f32   all head weights, H = nhead*nhid (head-major cols)
    # acat_ref  [H, 2*nhead] f32   block-diag [a_src | a_tgt]
    # bcast_ref [nhead, H]   f32   0/1 "repeat each head nhid times" matrix
    # bias_ref  [1, H]       f32   per-head bias, concatenated
    # mask_ref  [N, G]       f32   one-hot graph membership
    # lw_ref    [H, C], lb_ref [1, C]
    # out_ref   [G, C]
    nhead, hidden = bcast_ref.shape
    num_graphs = mask_ref.shape[1]

    # hW for every head at once. nfeat == 1 is a rank-1 product: keep it on the
    # VPU instead of wasting an MXU push/drain on a K=1 matmul.
    if x_ref.shape[1] == 1:
        h_all = x_ref[...] * w_ref[...]                                  # [N, H]
    else:
        h_all = jnp.dot(x_ref[...], w_ref[...],
                        preferred_element_type=jnp.float32)

    # Attention projections for all heads in one matmul.
    z = jnp.dot(h_all, acat_ref[...], preferred_element_type=jnp.float32)
    z_src = z[:, :nhead]                                                 # [N, nhead]
    z_tgt = z[:, nhead:]                                                 # [N, nhead]

    # Gathers: one bf16 incidence matmul per orientation. The target gather
    # carries both h[tgt] and z_tgt[tgt] in the same MXU pass.
    gt_payload = jnp.concatenate([h_all, z_tgt], axis=1).astype(jnp.bfloat16)
    t_rows = jnp.dot(t_ref[...], gt_payload,
                     preferred_element_type=jnp.float32)                 # [E, H+nhead]
    h_tgt = t_rows[:, :hidden]
    zt_e = t_rows[:, hidden:]
    zs_e = jnp.dot(s_ref[...], z_src.astype(jnp.bfloat16),
                   preferred_element_type=jnp.float32)                   # [E, nhead]

    # Edge scores + segment-softmax numerator (per-head global max shift,
    # matching values.max() per head in the reference).
    e = zs_e + zt_e
    e = jnp.where(e > 0, e, ALPHA * e)                                   # leaky_relu
    e_max = jnp.max(e, axis=0, keepdims=True)                            # [1, nhead]
    exp_v = jnp.exp(e - e_max)                                           # [E, nhead]

    # Scatter-add by source. The softmax denominator is constant per source
    # node, so divide AFTER aggregation: numerator and denominator ride a
    # single ST matmul.
    w_bcast = jnp.dot(exp_v, bcast_ref[...],
                      preferred_element_type=jnp.float32)                # [E, H]
    payload = jnp.concatenate([w_bcast * h_tgt, exp_v],
                              axis=1).astype(jnp.bfloat16)               # [E, H+nhead]
    agg = jnp.dot(st_ref[...], payload,
                  preferred_element_type=jnp.float32)                    # [N, H+nhead]
    numer = agg[:, :hidden]
    denom = agg[:, hidden:] + EPS                                        # [N, nhead]
    inv = pl.reciprocal(denom, approx=True)                              # EUP slot
    inv_b = jnp.dot(inv, bcast_ref[...],
                    preferred_element_type=jnp.float32)                  # [N, H]
    h_prime = numer * inv_b + bias_ref[...]                              # concat(heads)

    # ELU
    feat = jnp.where(h_prime > 0, h_prime, jnp.exp(h_prime) - 1.0)       # [N, H]

    # Global max pool per graph: additive mask + axis-0 max, statically
    # unrolled over the (tiny) number of graphs — no [G, N, H] broadcast.
    mask = mask_ref[...]
    pooled_rows = []
    for g in range(num_graphs):
        m_g = mask[:, g:g + 1]                                           # [N, 1]
        pooled_rows.append(
            jnp.max(feat + (m_g - 1.0) * NEG_BIG, axis=0, keepdims=True))
    pooled = jnp.concatenate(pooled_rows, axis=0)                        # [G, H]

    # Final Linear
    out_ref[...] = (jnp.dot(pooled, lw_ref[...],
                            preferred_element_type=jnp.float32) + lb_ref[...])


# ---------------------------------------------------------------------------
# Wrapper
# ---------------------------------------------------------------------------
def spgat_forward(x, edge_list, batch, params):
    N, nfeat = x.shape
    E = edge_list.shape[1]
    nhead, _, nhid = params["W"].shape
    hidden = nhead * nhid
    nclass = params["lin_w"].shape[1]
    num_graphs = params["num_graphs"]

    src, tgt = edge_list[0], edge_list[1]
    # bf16 incidence matrices: 0/1 are exact in bf16; halves HBM/VMEM bytes of
    # the dominant [E, N] buffers and feeds the native bf16 MXU path.
    S = jax.nn.one_hot(src, N, dtype=jnp.bfloat16)                       # [E, N]
    T = jax.nn.one_hot(tgt, N, dtype=jnp.bfloat16)                       # [E, N]
    ST = S.T                                                             # [N, E]

    # Head-fused parameter packing (columns are head-major -> torch.cat order).
    W_flat = jnp.transpose(params["W"], (1, 0, 2)).reshape(nfeat, hidden)
    eye_h = jnp.eye(nhead, dtype=jnp.float32)
    a_src = params["a_src"][:, :, 0]                                     # [nhead, nhid]
    a_tgt = params["a_tgt"][:, :, 0]
    A_src = (a_src[:, :, None] * eye_h[:, None, :]).reshape(hidden, nhead)
    A_tgt = (a_tgt[:, :, None] * eye_h[:, None, :]).reshape(hidden, nhead)
    A_cat = jnp.concatenate([A_src, A_tgt], axis=1)                      # [H, 2*nhead]
    head_bcast = jnp.kron(eye_h, jnp.ones((1, nhid), jnp.float32))       # [nhead, H]
    bias_flat = params["bias"][:, 0, :].reshape(1, hidden)               # [1, H]
    batch_mask = jax.nn.one_hot(batch, num_graphs, dtype=jnp.float32)    # [N, G]

    grid_spec = pltpu.PrefetchScalarGridSpec(
        num_scalar_prefetch=0,
        grid=(1,),
        in_specs=[
            pl.BlockSpec((N, nfeat), lambda i: (0, 0)),
            pl.BlockSpec((E, N), lambda i: (0, 0)),
            pl.BlockSpec((N, E), lambda i: (0, 0)),
            pl.BlockSpec((E, N), lambda i: (0, 0)),
            pl.BlockSpec((nfeat, hidden), lambda i: (0, 0)),
            pl.BlockSpec((hidden, 2 * nhead), lambda i: (0, 0)),
            pl.BlockSpec((nhead, hidden), lambda i: (0, 0)),
            pl.BlockSpec((1, hidden), lambda i: (0, 0)),
            pl.BlockSpec((N, num_graphs), lambda i: (0, 0)),
            pl.BlockSpec((hidden, nclass), lambda i: (0, 0)),
            pl.BlockSpec((1, nclass), lambda i: (0, 0)),
        ],
        out_specs=pl.BlockSpec((num_graphs, nclass), lambda i: (0, 0)),
    )

    out = pl.pallas_call(
        spgat_fused_kernel,
        out_shape=jax.ShapeDtypeStruct((num_graphs, nclass), jnp.float32),
        grid_spec=grid_spec,
        compiler_params=pltpu.CompilerParams(
            dimension_semantics=("arbitrary",)),
    )(x, S, ST, T, W_flat, A_cat, head_bcast, bias_flat, batch_mask,
      params["lin_w"], params["lin_b"])
    return out


# ---------------------------------------------------------------------------
# Pure-JAX reference (mirrors the PyTorch forward, eval mode, full f32)
# ---------------------------------------------------------------------------
def ref_forward(x, edge_list, batch, params):
    src, tgt = edge_list[0], edge_list[1]
    N = x.shape[0]
    nhead = params["W"].shape[0]
    outs = []
    for h in range(nhead):
        W = params["W"][h]
        a_s = params["a_src"][h]
        a_t = params["a_tgt"][h]
        b = params["bias"][h][0]
        hW = x @ W
        e = hW[src] @ a_s + hW[tgt] @ a_t
        e = jnp.where(e > 0, e, ALPHA * e)
        ev = jnp.exp(e - e.max())
        esum = jnp.zeros((N, 1), jnp.float32).at[src].add(ev) + EPS
        att = ev / esum[src]
        hp = jnp.zeros_like(hW).at[src].add(att * hW[tgt]) + b
        outs.append(hp)
    feat = jax.nn.elu(jnp.concatenate(outs, axis=1))
    G = params["num_graphs"]
    pooled = jnp.stack([
        jnp.max(jnp.where((batch == g)[:, None], feat, -NEG_BIG), axis=0)
        for g in range(G)
    ])
    return pooled @ params["lin_w"] + params["lin_b"]


if __name__ == "__main__":
    key = jax.random.PRNGKey(0)
    ks = jax.random.split(key, 8)

    # Model hyper-params from the module: nfeat=1, nhid=8, nhead=8, nclass=7
    nfeat, nhid, nhead, nclass = 1, 8, 8, 7

    # Small deterministic graph: N=8 nodes, E=16 edges, 2 graphs in the batch
    N, E, G = 8, 16, 2
    x = jax.random.normal(ks[0], (N, nfeat), dtype=jnp.float32)
    src = jnp.array([0, 0, 1, 1, 2, 2, 3, 3, 4, 4, 5, 5, 6, 6, 7, 7], jnp.int32)
    tgt = jnp.array([1, 2, 0, 3, 1, 3, 0, 2, 5, 6, 4, 7, 5, 7, 4, 6], jnp.int32)
    edge_list = jnp.stack([src, tgt])                    # [2, E]
    batch = jnp.array([0, 0, 0, 0, 1, 1, 1, 1], jnp.int32)

    # Deterministic parameter init (shapes follow SPGATConv / Linear(64, 7))
    params = {
        "W": 0.5 * jax.random.normal(ks[1], (nhead, nfeat, nhid), jnp.float32),
        "a_src": 0.5 * jax.random.normal(ks[2], (nhead, nhid, 1), jnp.float32),
        "a_tgt": 0.5 * jax.random.normal(ks[3], (nhead, nhid, 1), jnp.float32),
        "bias": 0.1 * jax.random.normal(ks[4], (nhead, 1, nhid), jnp.float32),
        "lin_w": 0.2 * jax.random.normal(ks[5], (nhead * nhid, nclass), jnp.float32),
        "lin_b": 0.1 * jax.random.normal(ks[6], (1, nclass), jnp.float32),
        "num_graphs": G,
    }

    out = spgat_forward(x, edge_list, batch, params)
    out = jax.block_until_ready(out)

    ref = jax.block_until_ready(ref_forward(x, edge_list, batch, params))
    # Tolerance reflects the bf16 gather/scatter path (hW rounded to an 8-bit
    # mantissa, ~0.2% per element; end-to-end drift vs. the f32 reference is
    # ~1e-2). Structural bugs would produce errors orders of magnitude larger.
    np.testing.assert_allclose(np.asarray(out), np.asarray(ref),
                               rtol=5e-2, atol=5e-2)

    assert out.shape == (G, nclass)
    print("KERNEL_OK")
</pallas_src>

<mosaic_0001>
module attributes {stable_mosaic.version = 11 : i64} {
  func.func @spgat_fused_kernel(%arg0: i32, %arg1: memref<8x1xf32, #tpu.memory_space<vmem>>, %arg2: memref<16x8xbf16, #tpu.memory_space<vmem>>, %arg3: memref<8x16xbf16, #tpu.memory_space<vmem>>, %arg4: memref<16x8xbf16, #tpu.memory_space<vmem>>, %arg5: memref<1x64xf32, #tpu.memory_space<vmem>>, %arg6: memref<64x16xf32, #tpu.memory_space<vmem>>, %arg7: memref<8x64xf32, #tpu.memory_space<vmem>>, %arg8: memref<1x64xf32, #tpu.memory_space<vmem>>, %arg9: memref<8x2xf32, #tpu.memory_space<vmem>>, %arg10: memref<64x7xf32, #tpu.memory_space<vmem>>, %arg11: memref<1x7xf32, #tpu.memory_space<vmem>>, %arg12: memref<2x7xf32, #tpu.memory_space<vmem>>) attributes {dimension_semantics = [#tpu.dimension_semantics<arbitrary>], iteration_bounds = array<i64: 1>, scalar_prefetch = 0 : i64, scratch_operands = 0 : i64, tpu.core_type = #tpu.core_type<tc>, window_params = [{pipeline_mode = #tpu.pipeline_mode<synchronous>, transform_indices = @transform_0, window_bounds = array<i64: 8, 1>}, {pipeline_mode = #tpu.pipeline_mode<synchronous>, transform_indices = @transform_1, window_bounds = array<i64: 16, 8>}, {pipeline_mode = #tpu.pipeline_mode<synchronous>, transform_indices = @transform_2, window_bounds = array<i64: 8, 16>}, {pipeline_mode = #tpu.pipeline_mode<synchronous>, transform_indices = @transform_3, window_bounds = array<i64: 16, 8>}, {pipeline_mode = #tpu.pipeline_mode<synchronous>, transform_indices = @transform_4, window_bounds = array<i64: 1, 64>}, {pipeline_mode = #tpu.pipeline_mode<synchronous>, transform_indices = @transform_5, window_bounds = array<i64: 64, 16>}, {pipeline_mode = #tpu.pipeline_mode<synchronous>, transform_indices = @transform_6, window_bounds = array<i64: 8, 64>}, {pipeline_mode = #tpu.pipeline_mode<synchronous>, transform_indices = @transform_7, window_bounds = array<i64: 1, 64>}, {pipeline_mode = #tpu.pipeline_mode<synchronous>, transform_indices = @transform_8, window_bounds = array<i64: 8, 2>}, {pipeline_mode = #tpu.pipeline_mode<synchronous>, transform_indices = @transform_9, window_bounds = array<i64: 64, 7>}, {pipeline_mode = #tpu.pipeline_mode<synchronous>, transform_indices = @transform_10, window_bounds = array<i64: 1, 7>}, {pipeline_mode = #tpu.pipeline_mode<synchronous>, transform_indices = @transform_11, window_bounds = array<i64: 2, 7>}]} {
    %c0 = arith.constant 0 : index
    %c0_0 = arith.constant 0 : index
    %0 = vector.load %arg1[%c0, %c0_0] : memref<8x1xf32, #tpu.memory_space<vmem>>, vector<8x1xf32>
    %c0_1 = arith.constant 0 : index
    %c0_2 = arith.constant 0 : index
    %1 = vector.load %arg5[%c0_1, %c0_2] : memref<1x64xf32, #tpu.memory_space<vmem>>, vector<1x64xf32>
    %2 = vector.broadcast %0 : vector<8x1xf32> to vector<8x64xf32>
    %3 = vector.broadcast %1 : vector<1x64xf32> to vector<8x64xf32>
    %4 = arith.mulf %2, %3 : vector<8x64xf32>
    %c0_3 = arith.constant 0 : index
    %c0_4 = arith.constant 0 : index
    %5 = vector.load %arg6[%c0_3, %c0_4] : memref<64x16xf32, #tpu.memory_space<vmem>>, vector<64x16xf32>
    %cst = arith.constant dense<0.000000e+00> : vector<8x16xf32>
    %6 = tpu.matmul %4, %5, %cst {dimension_numbers = #tpu.dot_dimension_numbers<[1], [0], [0], [1], [0, 0, 1, 1], [], []>} : vector<8x64xf32>, vector<64x16xf32>, vector<8x16xf32> -> vector<8x16xf32>
    %7 = vector.extract_strided_slice %6 {offsets = [0, 0], sizes = [8, 8], strides = [1, 1]} : vector<8x16xf32> to vector<8x8xf32>
    %8 = vector.extract_strided_slice %6 {offsets = [0, 8], sizes = [8, 8], strides = [1, 1]} : vector<8x16xf32> to vector<8x8xf32>
    %9 = tpu.concatenate %4, %8 in 1 : vector<8x64xf32>, vector<8x8xf32> -> vector<8x72xf32>
    %10 = arith.truncf %9 : vector<8x72xf32> to vector<8x72xbf16>
    %c0_5 = arith.constant 0 : index
    %c0_6 = arith.constant 0 : index
    %11 = vector.load %arg4[%c0_5, %c0_6] : memref<16x8xbf16, #tpu.memory_space<vmem>>, vector<16x8xbf16>
    %cst_7 = arith.constant dense<0.000000e+00> : vector<16x72xf32>
    %12 = tpu.matmul %11, %10, %cst_7 {dimension_numbers = #tpu.dot_dimension_numbers<[1], [0], [0], [1], [0, 0, 1, 1], [], []>} : vector<16x8xbf16>, vector<8x72xbf16>, vector<16x72xf32> -> vector<16x72xf32>
    %13 = vector.extract_strided_slice %12 {offsets = [0, 0], sizes = [16, 64], strides = [1, 1]} : vector<16x72xf32> to vector<16x64xf32>
    %14 = vector.extract_strided_slice %12 {offsets = [0, 64], sizes = [16, 8], strides = [1, 1]} : vector<16x72xf32> to vector<16x8xf32>
    %c0_8 = arith.constant 0 : index
    %c0_9 = arith.constant 0 : index
    %15 = vector.load %arg2[%c0_8, %c0_9] : memref<16x8xbf16, #tpu.memory_space<vmem>>, vector<16x8xbf16>
    %16 = arith.truncf %7 : vector<8x8xf32> to vector<8x8xbf16>
    %cst_10 = arith.constant dense<0.000000e+00> : vector<16x8xf32>
    %17 = tpu.matmul %15, %16, %cst_10 {dimension_numbers = #tpu.dot_dimension_numbers<[1], [0], [0], [1], [0, 0, 1, 1], [], []>} : vector<16x8xbf16>, vector<8x8xbf16>, vector<16x8xf32> -> vector<16x8xf32>
    %18 = arith.addf %17, %14 : vector<16x8xf32>
    %cst_11 = arith.constant 0.000000e+00 : f32
    %19 = vector.broadcast %cst_11 : f32 to vector<16x8xf32>
    %20 = arith.cmpf ogt, %18, %19 : vector<16x8xf32>
    %cst_12 = arith.constant 2.000000e-01 : f32
    %21 = vector.broadcast %cst_12 : f32 to vector<16x8xf32>
    %22 = arith.mulf %21, %18 : vector<16x8xf32>
    %23 = arith.select %20, %18, %22 : vector<16x8xi1>, vector<16x8xf32>
    %cst_13 = arith.constant dense<0xFF800000> : vector<8xf32>
    %24 = vector.multi_reduction <maximumf>, %23, %cst_13 [0] : vector<16x8xf32> to vector<8xf32>
    %25 = vector.shape_cast %24 : vector<8xf32> to vector<1x8xf32>
    %26 = vector.broadcast %25 : vector<1x8xf32> to vector<16x8xf32>
    %27 = arith.subf %23, %26 : vector<16x8xf32>
    %28 = math.exp %27 : vector<16x8xf32>
    %c0_14 = arith.constant 0 : index
    %c0_15 = arith.constant 0 : index
    %29 = vector.load %arg7[%c0_14, %c0_15] : memref<8x64xf32, #tpu.memory_space<vmem>>, vector<8x64xf32>
    %cst_16 = arith.constant dense<0.000000e+00> : vector<16x64xf32>
    %30 = tpu.matmul %28, %29, %cst_16 {dimension_numbers = #tpu.dot_dimension_numbers<[1], [0], [0], [1], [0, 0, 1, 1], [], []>} : vector<16x8xf32>, vector<8x64xf32>, vector<16x64xf32> -> vector<16x64xf32>
    %31 = arith.mulf %30, %13 : vector<16x64xf32>
    %32 = tpu.concatenate %31, %28 in 1 : vector<16x64xf32>, vector<16x8xf32> -> vector<16x72xf32>
    %33 = arith.truncf %32 : vector<16x72xf32> to vector<16x72xbf16>
    %c0_17 = arith.constant 0 : index
    %c0_18 = arith.constant 0 : index
    %34 = vector.load %arg3[%c0_17, %c0_18] : memref<8x16xbf16, #tpu.memory_space<vmem>>, vector<8x16xbf16>
    %cst_19 = arith.constant dense<0.000000e+00> : vector<8x72xf32>
    %35 = tpu.matmul %34, %33, %cst_19 {dimension_numbers = #tpu.dot_dimension_numbers<[1], [0], [0], [1], [0, 0, 1, 1], [], []>} : vector<8x16xbf16>, vector<16x72xbf16>, vector<8x72xf32> -> vector<8x72xf32>
    %36 = vector.extract_strided_slice %35 {offsets = [0, 0], sizes = [8, 64], strides = [1, 1]} : vector<8x72xf32> to vector<8x64xf32>
    %37 = vector.extract_strided_slice %35 {offsets = [0, 64], sizes = [8, 8], strides = [1, 1]} : vector<8x72xf32> to vector<8x8xf32>
    %cst_20 = arith.constant 1.000000e-10 : f32
    %38 = vector.broadcast %cst_20 : f32 to vector<8x8xf32>
    %39 = arith.addf %37, %38 : vector<8x8xf32>
    %40 = tpu.reciprocal %39 {approx = true} : vector<8x8xf32> -> vector<8x8xf32>
    %c0_21 = arith.constant 0 : index
    %c0_22 = arith.constant 0 : index
    %41 = vector.load %arg7[%c0_21, %c0_22] : memref<8x64xf32, #tpu.memory_space<vmem>>, vector<8x64xf32>
    %cst_23 = arith.constant dense<0.000000e+00> : vector<8x64xf32>
    %42 = tpu.matmul %40, %41, %cst_23 {dimension_numbers = #tpu.dot_dimension_numbers<[1], [0], [0], [1], [0, 0, 1, 1], [], []>} : vector<8x8xf32>, vector<8x64xf32>, vector<8x64xf32> -> vector<8x64xf32>
    %43 = arith.mulf %36, %42 : vector<8x64xf32>
    %c0_24 = arith.constant 0 : index
    %c0_25 = arith.constant 0 : index
    %44 = vector.load %arg8[%c0_24, %c0_25] : memref<1x64xf32, #tpu.memory_space<vmem>>, vector<1x64xf32>
    %45 = vector.broadcast %44 : vector<1x64xf32> to vector<8x64xf32>
    %46 = arith.addf %43, %45 : vector<8x64xf32>
    %cst_26 = arith.constant 0.000000e+00 : f32
    %47 = vector.broadcast %cst_26 : f32 to vector<8x64xf32>
    %48 = arith.cmpf ogt, %46, %47 : vector<8x64xf32>
    %49 = math.exp %46 : vector<8x64xf32>
    %cst_27 = arith.constant 1.000000e+00 : f32
    %50 = vector.broadcast %cst_27 : f32 to vector<8x64xf32>
    %51 = arith.subf %49, %50 : vector<8x64xf32>
    %52 = arith.select %48, %46, %51 : vector<8x64xi1>, vector<8x64xf32>
    %c0_28 = arith.constant 0 : index
    %c0_29 = arith.constant 0 : index
    %53 = vector.load %arg9[%c0_28, %c0_29] : memref<8x2xf32, #tpu.memory_space<vmem>>, vector<8x2xf32>
    %54 = vector.extract_strided_slice %53 {offsets = [0, 0], sizes = [8, 1], strides = [1, 1]} : vector<8x2xf32> to vector<8x1xf32>
    %cst_30 = arith.constant 1.000000e+00 : f32
    %55 = vector.broadcast %cst_30 : f32 to vector<8x1xf32>
    %56 = arith.subf %54, %55 : vector<8x1xf32>
    %cst_31 = arith.constant 1.000000e+30 : f32
    %57 = vector.broadcast %cst_31 : f32 to vector<8x1xf32>
    %58 = arith.mulf %56, %57 : vector<8x1xf32>
    %59 = vector.broadcast %58 : vector<8x1xf32> to vector<8x64xf32>
    %60 = arith.addf %52, %59 : vector<8x64xf32>
    %cst_32 = arith.constant dense<0xFF800000> : vector<64xf32>
    %61 = vector.multi_reduction <maximumf>, %60, %cst_32 [0] : vector<8x64xf32> to vector<64xf32>
    %62 = vector.shape_cast %61 : vector<64xf32> to vector<1x64xf32>
    %63 = vector.extract_strided_slice %53 {offsets = [0, 1], sizes = [8, 1], strides = [1, 1]} : vector<8x2xf32> to vector<8x1xf32>
    %cst_33 = arith.constant 1.000000e+00 : f32
    %64 = vector.broadcast %cst_33 : f32 to vector<8x1xf32>
    %65 = arith.subf %63, %64 : vector<8x1xf32>
    %cst_34 = arith.constant 1.000000e+30 : f32
    %66 = vector.broadcast %cst_34 : f32 to vector<8x1xf32>
    %67 = arith.mulf %65, %66 : vector<8x1xf32>
    %68 = vector.broadcast %67 : vector<8x1xf32> to vector<8x64xf32>
    %69 = arith.addf %52, %68 : vector<8x64xf32>
    %cst_35 = arith.constant dense<0xFF800000> : vector<64xf32>
    %70 = vector.multi_reduction <maximumf>, %69, %cst_35 [0] : vector<8x64xf32> to vector<64xf32>
    %71 = vector.shape_cast %70 : vector<64xf32> to vector<1x64xf32>
    %72 = tpu.concatenate %62, %71 in 0 : vector<1x64xf32>, vector<1x64xf32> -> vector<2x64xf32>
    %c0_36 = arith.constant 0 : index
    %c0_37 = arith.constant 0 : index
    %73 = vector.load %arg10[%c0_36, %c0_37] : memref<64x7xf32, #tpu.memory_space<vmem>>, vector<64x7xf32>
    %cst_38 = arith.constant dense<0.000000e+00> : vector<2x7xf32>
    %74 = tpu.matmul %72, %73, %cst_38 {dimension_numbers = #tpu.dot_dimension_numbers<[1], [0], [0], [1], [0, 0, 1, 1], [], []>} : vector<2x64xf32>, vector<64x7xf32>, vector<2x7xf32> -> vector<2x7xf32>
    %c0_39 = arith.constant 0 : index
    %c0_40 = arith.constant 0 : index
    %75 = vector.load %arg11[%c0_39, %c0_40] : memref<1x7xf32, #tpu.memory_space<vmem>>, vector<1x7xf32>
    %76 = vector.broadcast %75 : vector<1x7xf32> to vector<2x7xf32>
    %77 = arith.addf %74, %76 : vector<2x7xf32>
    %c0_41 = arith.constant 0 : index
    %c0_42 = arith.constant 0 : index
    %78 = vector.load %arg12[%c0_41, %c0_42] : memref<2x7xf32, #tpu.memory_space<vmem>>, vector<2x7xf32>
    tpu.vector_store %arg12[%c0_41, %c0_42], %77 {strides = array<i32>} : memref<2x7xf32, #tpu.memory_space<vmem>>, vector<2x7xf32>,
    return
  }
  func.func @transform_0(%arg0: i32) -> (i32, i32) {
    %c0_i32 = arith.constant 0 : i32
    %c0_i32_0 = arith.constant 0 : i32
    %c0_i32_1 = arith.constant 0 : i32
    return %c0_i32, %c0_i32_0 : i32, i32
  }
  func.func @transform_1(%arg0: i32) -> (i32, i32) {
    %c0_i32 = arith.constant 0 : i32
    %c0_i32_0 = arith.constant 0 : i32
    %c0_i32_1 = arith.constant 0 : i32
    return %c0_i32, %c0_i32_0 : i32, i32
  }
  func.func @transform_2(%arg0: i32) -> (i32, i32) {
    %c0_i32 = arith.constant 0 : i32
    %c0_i32_0 = arith.constant 0 : i32
    %c0_i32_1 = arith.constant 0 : i32
    return %c0_i32, %c0_i32_0 : i32, i32
  }
  func.func @transform_3(%arg0: i32) -> (i32, i32) {
    %c0_i32 = arith.constant 0 : i32
    %c0_i32_0 = arith.constant 0 : i32
    %c0_i32_1 = arith.constant 0 : i32
    return %c0_i32, %c0_i32_0 : i32, i32
  }
  func.func @transform_4(%arg0: i32) -> (i32, i32) {
    %c0_i32 = arith.constant 0 : i32
    %c0_i32_0 = arith.constant 0 : i32
    %c0_i32_1 = arith.constant 0 : i32
    return %c0_i32, %c0_i32_0 : i32, i32
  }
  func.func @transform_5(%arg0: i32) -> (i32, i32) {
    %c0_i32 = arith.constant 0 : i32
    %c0_i32_0 = arith.constant 0 : i32
    %c0_i32_1 = arith.constant 0 : i32
    return %c0_i32, %c0_i32_0 : i32, i32
  }
  func.func @transform_6(%arg0: i32) -> (i32, i32) {
    %c0_i32 = arith.constant 0 : i32
    %c0_i32_0 = arith.constant 0 : i32
    %c0_i32_1 = arith.constant 0 : i32
    return %c0_i32, %c0_i32_0 : i32, i32
  }
  func.func @transform_7(%arg0: i32) -> (i32, i32) {
    %c0_i32 = arith.constant 0 : i32
    %c0_i32_0 = arith.constant 0 : i32
    %c0_i32_1 = arith.constant 0 : i32
    return %c0_i32, %c0_i32_0 : i32, i32
  }
  func.func @transform_8(%arg0: i32) -> (i32, i32) {
    %c0_i32 = arith.constant 0 : i32
    %c0_i32_0 = arith.constant 0 : i32
    %c0_i32_1 = arith.constant 0 : i32
    return %c0_i32, %c0_i32_0 : i32, i32
  }
  func.func @transform_9(%arg0: i32) -> (i32, i32) {
    %c0_i32 = arith.constant 0 : i32
    %c0_i32_0 = arith.constant 0 : i32
    %c0_i32_1 = arith.constant 0 : i32
    return %c0_i32, %c0_i32_0 : i32, i32
  }
  func.func @transform_10(%arg0: i32) -> (i32, i32) {
    %c0_i32 = arith.constant 0 : i32
    %c0_i32_0 = arith.constant 0 : i32
    %c0_i32_1 = arith.constant 0 : i32
    return %c0_i32, %c0_i32_0 : i32, i32
  }
  func.func @transform_11(%arg0: i32) -> (i32, i32) {
    %c0_i32 = arith.constant 0 : i32
    %c0_i32_0 = arith.constant 0 : i32
    %c0_i32_1 = arith.constant 0 : i32
    return %c0_i32, %c0_i32_0 : i32, i32
  }
}

</mosaic_0001>

<bundles_post_ra>
// kernel: tpu_custom_call.1
= control target key start
LH: loop header
LB: loop body
LE: loop exit
PB: predicated region body
PF: predicated region fallthrough
CT: control target
= control target key end

     0   :  { %v829_v3 = vmov 0   ;;  %v830_v4 = vmov 0.0|0.0   ;;  %vm831_vm0 = vmmov 0   ;;  %v832_v11 = vmov 0.0   ;;  %s1026_s0 = inlined_call_operand.vmem [shape: f32[8,1], index: 0, kind: input, shape index: {}]   ;;  %s1027_s1 = inlined_call_operand.vmem [shape: bf16[16,8], index: 1, kind: input, shape index: {}]   ;;  %s1028_s2 = inlined_call_operand.vmem [shape: bf16[8,16], index: 2, kind: input, shape index: {}]   ;;  %s1029_s3 = inlined_call_operand.vmem [shape: bf16[16,8], index: 3, kind: input, shape index: {}]   ;;  %s1030_s4 = inlined_call_operand.vmem [shape: f32[1,64], index: 4, kind: input, shape index: {}]   ;;  %s1031_s5 = inlined_call_operand.vmem [shape: f32[64,16], index: 5, kind: input, shape index: {}]   ;;  %s1032_s6 = inlined_call_operand.vmem [shape: f32[8,64], index: 6, kind: input, shape index: {}]   ;;  %s1033_s7 = inlined_call_operand.vmem [shape: f32[1,64], index: 7, kind: input, shape index: {}]   ;;  %s1034_s8 = inlined_call_operand.vmem [shape: f32[8,2], index: 8, kind: input, shape index: {}]   ;;  %s1035_s9 = inlined_call_operand.vmem [shape: f32[64,7], index: 9, kind: input, shape index: {}]   ;;  %s1036_s10 = inlined_call_operand.vmem [shape: f32[1,7], index: 10, kind: input, shape index: {}]   ;;  %s1037_s11 = inlined_call_operand.hbm [shape: f32[2,7], index: 11, kind: output, shape index: {}]  }
   0x1   :  { %v40_v0 = vld [vmem:[%s1026_s0] sm:$0xff]  ;;  %v55_v2 = vld [vmem:[%s1031_s5 + $0x8] sm:$0xff]  ;;  %787 = vset.pattern.permute.xlu0 %v829_v3  ;;  %755 = vmatprep.subr.bf16.mxu0 %v830_v4  ;;  %v56_v6 = vld [vmem:[%s1031_s5 + $0x10] sm:$0xff] }
   0x2   :  { %v54_v1 = vld [vmem:[%s1031_s5] sm:$0xff]  ;;  %v57_v7 = vld [vmem:[%s1031_s5 + $0x18] sm:$0xff]  ;;  %44 = vperm.xlu0 %787, %v40_v0   ;;  %v59_v10 = vld [vmem:[%s1031_s5 + $0x28] sm:$0xff]  ;;  %705 = vmatprep.mubr.msk.f32.mxu0 %vm831_vm0, %v832_v11 }
   0x3   :  { %v756_v5 = vpack.c.bf16 %v55_v2, %v54_v1  ;;  %v58_v8 = vld [vmem:[%s1031_s5 + $0x20] sm:$0xff]  ;;  %v759_v9 = vpack.c.bf16 %v57_v7, %v56_v6  ;;  %714 = vmatprep.subr.bf16.mxu1 %v832_v11 }
   0x5   :  { %757 = vmatpush3.bf16.msra.mxu0 %v756_v5 }
   0x6   :  { %758 = vmatprep.subr.bf16.mxu0 %v830_v4 }
   0x7   :  { %16 = vsyncpa [#allocation3], 0  ;;  %716 = vmatprep.mubr.msk.bf16.mxu1 %vm831_vm0, %v832_v11  ;;  %v762_v12 = vpack.c.bf16 %v59_v10, %v58_v8  ;;  %v60_v13 = vld [vmem:[%s1031_s5 + $0x30] sm:$0xff]  ;;  %v61_v14 = vld [vmem:[%s1031_s5 + $0x38] sm:$0xff]  ;;  %vm62_vm1 = vcmask 523264   ;;  %vm153_vm2 = vcmask 1043456  }
   0x8   :  { %v765_v15 = vpack.c.bf16 %v61_v14, %v60_v13  ;;  %v645_v16 = vld [vmem:[%s1030_s4] ss:$0 sm:$0xff]  ;;  %s833_s5 = smov 56   ;;  %vm149_vm3 = vcmask 64512   ;;  %vm376_vm6 = vcmask 130048   ;;  %vm539_vm8 = vcmask 1040384  }
   0x9   :  { %760 = vmatpush3.bf16.msra.mxu0 %v759_v9  ;;  %v796_v23 = vld [vmem:[%s1027_s1] sm:$0xff]   ;;  %s834_s1 = smov 64   ;;  %s836_s4 = smov [#allocation2]   ;;  %vm629_vm9 = vcmask 50176  }
   0xa   :  { %761 = vmatprep.subr.bf16.mxu0 %v830_v4  ;;  %v795_v28 = vld [vmem:[%s1029_s3] sm:$0xff]   ;;  %s637_s19 = sshll.u32 %s836_s4, 4  ;;  %s638_s19 = int_to_ptr.vmem [resolvable:$true] %s637_s19 }
   0xb   :  { %v282_v37 = vld [vmem:[%s1032_s6] sm:$0xff]  ;;  %p810_p1 = scmp.lt.s32.totalorder %s638_s19, %s638_s19 }
   0xc   :  { %v511_v59 = vld [vmem:[%s1034_s8] sm:$0xff] }
   0xd   :  { %763 = vmatpush3.bf16.msra.mxu0 %v762_v12  ;;  %v657_v61 = vadd.f32 -1.0, %v511_v59  ;;  %v375_v13 = vld [vmem:[%s1028_s2] sm:$0xf] }
   0xe   :  { %764 = vmatprep.subr.bf16.mxu0 %v830_v4 }
   0xf   :  { %v513_v0 = vmul.f32 1e+30, %v657_v61 }
  0x11   :  { %766 = vmatpush3.bf16.msra.mxu0 %v765_v15 }
  0x12   :  { %708 = vmatprep.subr.bf16.mxu0 %v832_v11 }
  0x81   :  { %v45_v17 = vpop.permute.xlu0 %44 }
  0x82   :  { %v53_v18 = vmul.f32 %v645_v16, %v45_v17 }
  0x84   :  { %706 = vmatmul.mubr.msk.f32.vlgmr.msra.gmra.mrb[0].mxu0 %vm62_vm1, %v53_v18 }
  0x85   :  { %710 = vmatprep.mubr.msk.bf16.mxu0 %vm831_vm0, %v832_v11 }
 0x157   :  { %v132_v19 = vpop.f32.mrb[0].mxu0 }
 0x158   :  { %v200_v20 = vpack.c.bf16 %v132_v19, %v132_v19  ;;  %137 = vrot.lane.b32.xlu0 %v132_v19, %s833_s5  ;;  %v707_v21 = vpop.f32.mrb[1].mxu0 }
 0x15a   :  { %v218_v22 = vsel %vm153_vm2, %v200_v20, 0 }
 0x15b   :  { %715 = vmatpush3.bf16.msra.mxu1 %v218_v22  ;;  %v542_v22 = vld [vmem:[%s1035_s9 + $0x8] sm:$0xff] }
 0x15c   :  { %725 = vmatprep.subr.bf16.mxu1 %v832_v11 }
 0x15e   :  { %717 = vmatmul.mubr.msk.bf16.vlgmr.msra.gmra.mrb[0].mxu1 %vm149_vm3, %v796_v23 }
 0x15f   :  { %727 = vmatprep.mubr.msk.bf16.mxu1 %vm831_vm0, %v832_v11 }
 0x1ca   :  { %v138_v24 = vpop.permute.xlu0 %137 }
 0x1cb   :  { %v140_v25 = vsel %vm62_vm1, %v53_v18, %v138_v24  ;;  %v835_v18 = vmov 1   ;;  %v543_v24 = vld [vmem:[%s1035_s9 + $0x10] sm:$0xff] }
 0x1cc   :  { %v141_v26 = vpack.c.bf16 %v140_v25, %v140_v25  ;;  %793 = vset.pattern.permute.xlu1 %v835_v18  ;;  %v544_v25 = vld [vmem:[%s1035_s9 + $0x18] sm:$0xff] }
 0x1ce   :  { %v155_v27 = vsel %vm153_vm2, %v141_v26, 0  ;;  %v771_v26 = vpack.c.bf16 %v544_v25, %v543_v24 }
 0x1cf   :  { %709 = vmatpush3.bf16.msra.mxu0 %v155_v27  ;;  %v545_v27 = vld [vmem:[%s1035_s9 + $0x20] sm:$0xff] }
 0x1d0   :  { %720 = vmatprep.subr.mxu0 %v282_v37 }
 0x1d2   :  { %711 = vmatmul.mubr.msk.bf16.vlgmr.msra.gmra.mrb[4].mxu0 %vm149_vm3, %v795_v28  ;;  %v546_v28 = vld [vmem:[%s1035_s9 + $0x28] sm:$0xff] }
 0x1d3   :  { %721 = vmatpush3.msra.mxu0 %v282_v37 }
 0x1d4   :  { %731 = vmatprep.subr.mxu0 %v832_v11 }
 0x231   :  { %v254_v29 = vpop.f32.mrb[0].mxu1 }
 0x232   :  { %v718_v30 = vpop.f32.mrb[1].mxu1 }
 0x233   :  { %v257_v31 = vpop.f32.mrb[2].mxu1  ;;  %v547_v30 = vld [vmem:[%s1035_s9 + $0x30] sm:$0xff] }
 0x234   :  { %v719_v32 = vpop.f32.mrb[3].mxu1 }
 0x2a5   :  { %v191_v33 = vpop.f32.mrb[4].mxu0 }
 0x2a6   :  { %208 = vrot.lane.b32.xlu1 %v191_v33, %s834_s1  ;;  %v712_v34 = vpop.f32.mrb[5].mxu0 }
 0x2a7   :  { %v194_v35 = vpop.f32.mrb[6].mxu0  ;;  %v655_v34 = vld [vmem:[%s1033_s7] ss:$0 sm:$0xff] }
 0x2a8   :  { %v713_v36 = vpop.f32.mrb[7].mxu0 }
 0x2aa   :  { %210 = vrot.lane.b32.xlu1 %v194_v35, %s834_s1 }
 0x318   :  { %v209_v38 = vpop.permute.xlu1 %208 }
 0x319   :  { %v255_v39 = vadd.f32 %v254_v29, %v209_v38  ;;  %v774_v29 = vpack.c.bf16 %v546_v28, %v545_v27 }
 0x31b   :  { %v263_v40 = vmul.f32 0.2, %v255_v39  ;;  %vm261_vm4 = vcmp.gt.f32.partialorder %v255_v39, 0.0 }
 0x31c   :  { %v211_v41 = vpop.permute.xlu1 %210 }
 0x31d   :  { %v258_v42 = vadd.f32 %v257_v31, %v211_v41  ;;  %v265_v43 = vsel %vm261_vm4, %v255_v39, %v263_v40  ;;  %v548_v31 = vld [vmem:[%s1035_s9 + $0x38] sm:$0xff] }
 0x31e   :  { %v267_v46 = vsel %vm149_vm3, %v265_v43, -inf  ;;  %v777_v32 = vpack.c.bf16 %v548_v31, %v547_v30 }
 0x31f   :  { %vm262_vm5 = vcmp.gt.f32.partialorder %v258_v42, 0.0  ;;  %v264_v44 = vmul.f32 0.2, %v258_v42 }
 0x321   :  { %v266_v45 = vsel %vm262_vm5, %v258_v42, %v264_v44 }
 0x322   :  { %v268_v47 = vsel %vm149_vm3, %v266_v45, -inf }
 0x323   :  { %v269_v48 = vmax.f32 %v267_v46, %v268_v47 }
 0x325   :  { %v270_v49 = vrot.slane %v269_v48, 4 }
 0x327   :  { %v271_v50 = vmax.f32 %v269_v48, %v270_v49 }
 0x329   :  { %v272_v51 = vrot.slane %v271_v50, 2 }
 0x32b   :  { %v273_v52 = vmax.f32 %v271_v50, %v272_v51 }
 0x32d   :  { %v274_v53 = vrot.slane %v273_v52, 1 }
 0x32f   :  { %v275_v54 = vmax.f32 %v273_v52, %v274_v53 }
 0x331   :  { %v276_v55 = vsub.f32 %v265_v43, %v275_v54  ;;  %v277_v56 = vsub.f32 %v266_v45, %v275_v54 }
 0x333   :  { %v278_v57 = vmul.f32 1.442695, %v276_v55  ;;  %v280_v58 = vmul.f32 1.442695, %v277_v56 }
 0x335   :  { %797 = vpow2.f32 %v278_v57 }
 0x336   :  { %799 = vpow2.f32 %v280_v58 }
 0x33f   :  { %v798_v60 = vpop.eup %797 }
 0x340   :  { %v800_v62 = vpop.eup %799  ;;  %722 = vmatprep.mubr.msk.f32.mxu0 %vm149_vm3, %v798_v60 }
 0x341   :  { %723 = vmatmul.mubr.msk.f32.vlgmr.msra.gmra.mrb[2].mxu0 %vm149_vm3, %v800_v62  ;;  %v788_v63 = vpack.i.bf16 %v800_v62, %v798_v60  ;;  %v658_v60 = vld [vmem:[%s1036_s10] ss:$0 sm:$0xff] }
 0x342   :  { %732 = vmatpush3.msra.mxu0 %v282_v37  ;;  %733 = vmatprep.mubr.msk.f32.mxu0 %vm831_vm0, %v832_v11 }
 0x343   :  { %789 = vrot.lane.b32.xlu0 %v788_v63, %s834_s1 }
 0x347   :  { %516 = vperm.xlu0 %787, %v513_v0  }
 0x34b   :  { %794 = vset.pattern.permute.xlu0 %v835_v18 }
 0x3b5   :  { %v790_v1 = vpop.permute.xlu0 %789 }
 0x3b6   :  { %v792_v3 = vunpack.i.h.bf16 %v790_v1  ;;  %v791_v7 = vunpack.i.l.bf16 %v790_v1 }
 0x3c6   :  { %v517_v41 = vpop.permute.xlu0 %516 }
 0x414   :  { %v724_v2 = vpop.f32.mrb[2].mxu0 }
 0x415   :  { %v365_v5 = vmul.f32 %v724_v2, %v194_v35  ;;  %v355_v6 = vpop.f32.mrb[3].mxu0 }
 0x416   :  { %v364_v8 = vmul.f32 %v355_v6, %v191_v33 }
 0x417   :  { %v373_v9 = vsel %vm62_vm1, %v365_v5, %v792_v3 }
 0x418   :  { %v372_v10 = vsel %vm62_vm1, %v364_v8, %v791_v7 }
 0x419   :  { %v374_v12 = vpack.c.bf16 %v373_v9, %v372_v10 }
 0x41b   :  { %726 = vmatpush3.bf16.msra.mxu1 %v374_v12 }
 0x41c   :  { %767 = vmatprep.subr.bf16.mxu1 %v830_v4 }
 0x41e   :  { %728 = vmatmul.mubr.msk.bf16.vlgmr.msra.gmra.mrb[4].mxu1 %vm376_vm6, %v375_v13 }
 0x41f   :  { %752 = vmatprep.mubr.msk.f32.mxu1 %vm831_vm0, %v832_v11  ;;  %v541_v11 = vld [vmem:[%s1035_s9] sm:$0xff] }
 0x420   :  { %v768_v23 = vpack.c.bf16 %v542_v22, %v541_v11 }
 0x422   :  { %769 = vmatpush3.bf16.msra.mxu1 %v768_v23 }
 0x423   :  { %770 = vmatprep.subr.bf16.mxu1 %v830_v4 }
 0x426   :  { %772 = vmatpush3.bf16.msra.mxu1 %v771_v26 }
 0x427   :  { %773 = vmatprep.subr.bf16.mxu1 %v830_v4 }
 0x42a   :  { %775 = vmatpush3.bf16.msra.mxu1 %v774_v29 }
 0x42b   :  { %776 = vmatprep.subr.bf16.mxu1 %v830_v4 }
 0x42e   :  { %778 = vmatpush3.bf16.msra.mxu1 %v777_v32 }
 0x4f1   :  { %v414_v14 = vpop.f32.mrb[4].mxu1 }
 0x4f2   :  { %v420_v15 = vadd.f32 1e-10, %v414_v14  ;;  %v729_v16 = vpop.f32.mrb[5].mxu1 }
 0x4f3   :  { %v417_v17 = vpop.f32.mrb[6].mxu1 }
 0x4f4   :  { %801 = vrcp.f32 %v420_v15  ;;  %v730_v19 = vpop.f32.mrb[7].mxu1 }
 0x4fe   :  { %v802_v20 = vpop.eup %801 }
 0x4ff   :  { %423 = vrot.lane.b32.xlu1 %v802_v20, %s834_s1  ;;  %s805_s1 = scalar_lea.vmem %s638_s19, 32 }
 0x500   :  { %p806_p0 = scmp.ne.s32.totalorder %s638_s19, %s805_s1  ;;  %p811_p2 = scmp.lt.s32.totalorder %s805_s1, %s805_s1 }
 0x502   :  { %p812_p3 = por %p811_p2, %p810_p1 }
 0x503   :  { %528 = vperm.xlu1 %793, %v513_v0  }
 0x504   :  { %p813_p4 = pnand %p812_p3, %p806_p0 }
 0x571   :  { %v424_v21 = vpop.permute.xlu1 %423 }
 0x572   :  { %734 = vmatmul.mubr.msk.f32.vlgmr.msra.gmra.mrb[8].mxu0 %vm149_vm3, %v424_v21 }
 0x582   :  { %v529_v40 = vpop.permute.xlu1 %528 }
 0x645   :  { %v493_v33 = vpop.f32.mrb[8].mxu0 }
 0x646   :  { %v497_v35 = vmul.f32 %v493_v33, %v414_v14  ;;  %v735_v36 = vpop.f32.mrb[9].mxu0 }
 0x648   :  { %v505_v37 = vadd.f32 %v655_v34, %v497_v35 }
 0x64a   :  { %v507_v38 = vmul.f32 1.442695, %v505_v37  ;;  %vm506_vm7 = vcmp.gt.f32.partialorder %v505_v37, 0.0 }
 0x64c   :  { %803 = vpow2.f32 %v507_v38 }
 0x656   :  { %v804_v4 = vpop.eup %803 }
 0x657   :  { %v656_v39 = vadd.f32 -1.0, %v804_v4 }
 0x659   :  { %v510_v42 = vsel %vm506_vm7, %v505_v37, %v656_v39 }
 0x65a   :  { %v519_v43 = vadd.f32 %v517_v41, %v510_v42  ;;  %v531_v44 = vadd.f32 %v529_v40, %v510_v42 }
 0x65c   :  { %v520_v45 = vsel %vm62_vm1, %v519_v43, -inf  ;;  %v532_v46 = vsel %vm62_vm1, %v531_v44, -inf }
 0x65d   :  { %v521_v47 = vrot.slane %v520_v45, 4  ;;  %v533_v48 = vrot.slane %v532_v46, 4 }
 0x65f   :  { %v522_v49 = vmax.f32 %v520_v45, %v521_v47  ;;  %v534_v50 = vmax.f32 %v532_v46, %v533_v48 }
 0x661   :  { %v523_v51 = vrot.slane %v522_v49, 2  ;;  %v535_v52 = vrot.slane %v534_v50, 2 }
 0x663   :  { %v524_v53 = vmax.f32 %v522_v49, %v523_v51  ;;  %v536_v54 = vmax.f32 %v534_v50, %v535_v52 }
 0x665   :  { %v525_v55 = vrot.slane %v524_v53, 1  ;;  %v537_v56 = vrot.slane %v536_v54, 1 }
 0x667   :  { %v526_v57 = vmax.f32 %v524_v53, %v525_v55  ;;  %v538_v58 = vmax.f32 %v536_v54, %v537_v56 }
 0x669   :  { %v540_v59 = vsel %vm539_vm8, %v526_v57, %v538_v58 }
 0x66a   :  { %753 = vmatmul.mubr.msk.f32.vlgmr.msra.gmra.mrb[8].mxu1 %vm62_vm1, %v540_v59 }
 0x73d   :  { %v625_v61 = vpop.f32.mrb[8].mxu1 }
 0x73e   :  { %v626_v62 = vadd.f32 %v658_v60, %v625_v61  ;;  %v754_v63 = vpop.f32.mrb[9].mxu1 }
 0x740   :  { %630 = vst.msk [vmem:[#allocation2] sm:$0x3] %vm629_vm9, %v626_v62 }
 0x741   :  { %816 = shalt.err (!%p813_p4)
}
 0x742   :  { %s817_s3 = scalar_lea.hbm %s1037_s11, 32 }
 0x743   :  { %p818_p5 = scmp.ne.s32.totalorder %s1037_s11, %s817_s3  ;;  %p821_p6 = scmp.lt.u32.totalorder %s817_s3, %s1037_s11 }
 0x745   :  { %p823_p7 = pnand %p821_p6, %p818_p5 }
 0x747   :  { %826 = shalt.err (!%p823_p7)
}
 0x748   :  { %640 = dma.vmem_to_hbm [thread:$0]  %s638_s19, 32, %s1037_s11, [#allocation3]  }
 0x749   :  { %827 = dma.done.wait [#allocation3], 32  }
 0x74a   :  { %828 = vsyncadd [#allocation3], 4294967264 }
 0x74b   :  { %644 = vsyncpa [#allocation3], 1 }

</bundles_post_ra>
